<compile_context>
chip_gen: v5e
topology: v5e:2x2
jax: 0.10.0
libtpu: 0.0.40
codegen_flags: <defaults>
</compile_context>

<pallas_src>
import functools

import jax
import jax.numpy as jnp
from jax import lax
from jax.experimental import pallas as pl
from jax.experimental.pallas import tpu as pltpu


def _stackcnn_kernel(*refs, num_layers, batch_block, ksize, pad, lens, chans):
    # refs = [x, w_0, b_0, ..., w_{n-1}, b_{n-1}, out, buf_a, buf_b]
    x_ref = refs[0]
    w_refs = [refs[1 + 2 * l] for l in range(num_layers)]
    b_refs = [refs[2 + 2 * l] for l in range(num_layers)]
    o_ref = refs[1 + 2 * num_layers]
    bufs = (refs[2 + 2 * num_layers], refs[3 + 2 * num_layers])

    # In-kernel zero padding: place the input block with a `pad`-row halo into a
    # zeroed VMEM buffer (no HBM pad pass in the wrapper).
    src = bufs[0]
    src[...] = jnp.zeros_like(src)
    src[:, pad:pad + lens[0], :chans[0]] = x_ref[...].astype(jnp.float32)

    for l in range(num_layers):
        l_out = lens[l + 1]
        c_in = chans[l]
        c_out = chans[l + 1]
        w = w_refs[l][...]          # (ksize * c_in, c_out), f32
        bias = b_refs[l][...]       # (1, c_out), f32
        is_last = l == num_layers - 1
        if not is_last:
            dst = bufs[(l + 1) % 2]
            dst[...] = jnp.zeros_like(dst)  # fresh zero halo / stale-data guard

        for bb in range(batch_block):       # small static unrolled loop
            # Fuse the K taps into ONE matmul: (l_out, K*c_in) @ (K*c_in, c_out).
            taps = [src[bb, k:k + l_out, :c_in] for k in range(ksize)]
            patches = jnp.concatenate(taps, axis=-1) if ksize > 1 else taps[0]
            h = jnp.dot(patches, w, preferred_element_type=jnp.float32)
            h = jnp.maximum(h + bias, 0.0)  # bias + ReLU, f32
            if is_last:
                # Fused AdaptiveAvgPool1d(1): mean over the length axis.
                o_ref[bb] = (jnp.sum(h, axis=0, keepdims=True)
                             * (1.0 / l_out)).astype(o_ref.dtype)
            else:
                dst[bb, pad:pad + l_out, :c_out] = h
        if not is_last:
            src = dst


def _pick_batch_block(batch):
    # A few batch elements per grid step amortize the ~0.35us per-step overhead
    # while keeping the grid extent >= 2 so both v7x TensorCores get work.
    for bb in (8, 4, 2, 1):
        if batch % bb == 0 and batch // bb >= 2:
            return bb
    return 1


def stack_cnn_forward(x_ncl, params, *, padding, batch_block=None):
    """Fused StackCNN forward.

    x_ncl: (B, C_in, L) in PyTorch NCL layout.
    params: list of (w, b) with PyTorch Conv1d layout w: (C_out, C_in, K), b: (C_out,).
    stride is fixed at 1 (as in the reference module docstring).
    """
    batch, c0, seq_len = x_ncl.shape
    num_layers = len(params)
    ksize = params[0][0].shape[-1]

    # Per-layer channel counts and output lengths (stride=1).
    chans = [c0] + [w.shape[0] for (w, _) in params]
    lens = [seq_len]
    for _ in range(num_layers):
        lens.append(lens[-1] + 2 * padding - ksize + 1)
    assert min(lens) >= 1, "sequence too short for this kernel_size/padding"

    # Channels-last activations; repack weights (C_out, C_in, K) -> (K*C_in, C_out).
    x_blc = jnp.transpose(x_ncl, (0, 2, 1)).astype(jnp.float32)
    packed = []
    for (w, b) in params:
        c_out, c_in, k = w.shape
        w_p = jnp.transpose(w, (2, 1, 0)).reshape(k * c_in, c_out)
        packed.append(w_p.astype(jnp.float32))
        packed.append(b.reshape(1, c_out).astype(jnp.float32))

    bb = batch_block if batch_block is not None else _pick_batch_block(batch)
    assert batch % bb == 0, "batch_block must divide batch"
    grid = (batch // bb,)

    c_max = max(chans)
    lp_max = max(lens[l] + 2 * padding for l in range(num_layers))

    kern = functools.partial(
        _stackcnn_kernel, num_layers=num_layers, batch_block=bb, ksize=ksize,
        pad=padding, lens=tuple(lens), chans=tuple(chans))

    in_specs = [pl.BlockSpec((bb, seq_len, c0), lambda i: (i, 0, 0))]
    for p in packed:
        in_specs.append(pl.BlockSpec(p.shape, lambda i: (0, 0)))

    out = pl.pallas_call(
        kern,
        out_shape=jax.ShapeDtypeStruct((batch, 1, chans[-1]), jnp.float32),
        grid_spec=pltpu.PrefetchScalarGridSpec(
            num_scalar_prefetch=0,
            grid=grid,
            in_specs=in_specs,
            out_specs=pl.BlockSpec((bb, 1, chans[-1]), lambda i: (i, 0, 0)),
            scratch_shapes=[
                pltpu.VMEM((bb, lp_max, c_max), jnp.float32),  # ping
                pltpu.VMEM((bb, lp_max, c_max), jnp.float32),  # pong
            ]),
        compiler_params=pltpu.CompilerParams(
            dimension_semantics=("parallel",),
            vmem_limit_bytes=48 * 1024 * 1024),  # headroom under v7x's 64 MiB
    )(x_blc, *packed)
    return out[:, 0, :]


class StackCNN:
    """JAX/Pallas port of torchdrug StackCNN (stride must be 1)."""

    def __init__(self, layer_nums, in_channels, out_channels,
                 kernel_size=3, stride=1, padding=1, key=None):
        assert stride == 1, "only stride=1 supported (as in the reference docstring)"
        self.padding = padding
        self.params = []
        key = jax.random.PRNGKey(0) if key is None else key
        c_in = in_channels
        for _ in range(layer_nums):
            key, wk, bk = jax.random.split(key, 3)
            fan_in = c_in * kernel_size
            bound = 1.0 / float(fan_in) ** 0.5
            # PyTorch Conv1d weight layout: (C_out, C_in, K); uniform(-1/sqrt(fan_in), ..)
            w = jax.random.uniform(wk, (out_channels, c_in, kernel_size),
                                   jnp.float32, -bound, bound)
            b = jax.random.uniform(bk, (out_channels,), jnp.float32, -bound, bound)
            self.params.append((w, b))
            c_in = out_channels
        # TODO(synk): bf16 activations/weights at the HBM boundary (keep f32 MXU
        # accumulate) would halve memory traffic; kept f32 here for exact parity.

    def __call__(self, x_ncl):
        # x_ncl: (B, C_in, L) -- PyTorch NCL layout. Returns (B, C_out).
        return stack_cnn_forward(x_ncl, self.params, padding=self.padding)


def _reference(x_ncl, params, padding):
    """Pure-JAX reference matching PyTorch Conv1d/ReLU/AdaptiveAvgPool1d."""
    h = x_ncl.astype(jnp.float32)
    for (w, b) in params:
        h = lax.conv_general_dilated(
            h, w.astype(jnp.float32), window_strides=(1,),
            padding=[(padding, padding)],
            dimension_numbers=("NCH", "OIH", "NCH"),
            precision=lax.Precision.HIGHEST)
        h = jnp.maximum(h + b[None, :, None], 0.0)
    return jnp.mean(h, axis=-1)


if __name__ == "__main__":
    B, C_in, L, C_out = 2, 4, 16, 32
    layer_nums = 2

    x = jax.random.normal(jax.random.PRNGKey(0), (B, C_in, L), jnp.float32)
    model = StackCNN(layer_nums, C_in, C_out, kernel_size=3, stride=1,
                     padding=1, key=jax.random.PRNGKey(42))

    out = model(x)
    out = jax.block_until_ready(out)

    assert out.shape == (B, C_out), out.shape
    ref = _reference(x, model.params, padding=1)
    assert jnp.allclose(out, ref, atol=2e-3, rtol=1e-2), "mismatch vs reference"

    print("KERNEL_OK")
</pallas_src>

<mosaic_0001>
module attributes {stable_mosaic.version = 11 : i64} {
  func.func @_stackcnn_kernel(%arg0: i32, %arg1: memref<1x16x4xf32, #tpu.memory_space<vmem>>, %arg2: memref<12x32xf32, #tpu.memory_space<vmem>>, %arg3: memref<1x32xf32, #tpu.memory_space<vmem>>, %arg4: memref<96x32xf32, #tpu.memory_space<vmem>>, %arg5: memref<1x32xf32, #tpu.memory_space<vmem>>, %arg6: memref<1x1x32xf32, #tpu.memory_space<vmem>>, %arg7: memref<1x18x32xf32, #tpu.memory_space<vmem>>, %arg8: memref<1x18x32xf32, #tpu.memory_space<vmem>>) attributes {dimension_semantics = [#tpu.dimension_semantics<parallel>], iteration_bounds = array<i64: 2>, scalar_prefetch = 0 : i64, scratch_operands = 2 : i64, tpu.core_type = #tpu.core_type<tc>, window_params = [{transform_indices = @transform_0, window_bounds = array<i64: 1, 16, 4>}, {pipeline_mode = #tpu.pipeline_mode<synchronous>, transform_indices = @transform_1, window_bounds = array<i64: 12, 32>}, {pipeline_mode = #tpu.pipeline_mode<synchronous>, transform_indices = @transform_2, window_bounds = array<i64: 1, 32>}, {pipeline_mode = #tpu.pipeline_mode<synchronous>, transform_indices = @transform_3, window_bounds = array<i64: 96, 32>}, {pipeline_mode = #tpu.pipeline_mode<synchronous>, transform_indices = @transform_4, window_bounds = array<i64: 1, 32>}, {transform_indices = @transform_5, window_bounds = array<i64: 1, 1, 32>}]} {
    %cst = arith.constant 0.000000e+00 : f32
    %0 = vector.broadcast %cst : f32 to vector<1x18x32xf32>
    %c0 = arith.constant 0 : index
    %c0_0 = arith.constant 0 : index
    %c0_1 = arith.constant 0 : index
    %1 = vector.load %arg7[%c0, %c0_0, %c0_1] : memref<1x18x32xf32, #tpu.memory_space<vmem>>, vector<1x18x32xf32>
    tpu.vector_store %arg7[%c0, %c0_0, %c0_1], %0 {strides = array<i32>} : memref<1x18x32xf32, #tpu.memory_space<vmem>>, vector<1x18x32xf32>,
    %c0_2 = arith.constant 0 : index
    %c0_3 = arith.constant 0 : index
    %c0_4 = arith.constant 0 : index
    %2 = vector.load %arg1[%c0_2, %c0_3, %c0_4] : memref<1x16x4xf32, #tpu.memory_space<vmem>>, vector<1x16x4xf32>
    %c0_5 = arith.constant 0 : index
    %c1 = arith.constant 1 : index
    %c0_6 = arith.constant 0 : index
    %3 = vector.load %arg7[%c0_5, %c1, %c0_6] : memref<1x18x32xf32, #tpu.memory_space<vmem>>, vector<1x16x4xf32>
    tpu.vector_store %arg7[%c0_5, %c1, %c0_6], %2 {strides = array<i32>} : memref<1x18x32xf32, #tpu.memory_space<vmem>>, vector<1x16x4xf32>,
    %c0_7 = arith.constant 0 : index
    %c0_8 = arith.constant 0 : index
    %4 = vector.load %arg2[%c0_7, %c0_8] : memref<12x32xf32, #tpu.memory_space<vmem>>, vector<12x32xf32>
    %c0_9 = arith.constant 0 : index
    %c0_10 = arith.constant 0 : index
    %5 = vector.load %arg3[%c0_9, %c0_10] : memref<1x32xf32, #tpu.memory_space<vmem>>, vector<1x32xf32>
    %cst_11 = arith.constant 0.000000e+00 : f32
    %6 = vector.broadcast %cst_11 : f32 to vector<1x18x32xf32>
    %c0_12 = arith.constant 0 : index
    %c0_13 = arith.constant 0 : index
    %c0_14 = arith.constant 0 : index
    %7 = vector.load %arg8[%c0_12, %c0_13, %c0_14] : memref<1x18x32xf32, #tpu.memory_space<vmem>>, vector<1x18x32xf32>
    tpu.vector_store %arg8[%c0_12, %c0_13, %c0_14], %6 {strides = array<i32>} : memref<1x18x32xf32, #tpu.memory_space<vmem>>, vector<1x18x32xf32>,
    %c0_15 = arith.constant 0 : index
    %c0_16 = arith.constant 0 : index
    %c0_17 = arith.constant 0 : index
    %8 = vector.load %arg7[%c0_15, %c0_16, %c0_17] : memref<1x18x32xf32, #tpu.memory_space<vmem>>, vector<1x16x4xf32>
    %9 = vector.shape_cast %8 : vector<1x16x4xf32> to vector<16x4xf32>
    %c0_18 = arith.constant 0 : index
    %c1_19 = arith.constant 1 : index
    %c0_20 = arith.constant 0 : index
    %10 = vector.load %arg7[%c0_18, %c1_19, %c0_20] : memref<1x18x32xf32, #tpu.memory_space<vmem>>, vector<1x16x4xf32>
    %11 = vector.shape_cast %10 : vector<1x16x4xf32> to vector<16x4xf32>
    %c0_21 = arith.constant 0 : index
    %c2 = arith.constant 2 : index
    %c0_22 = arith.constant 0 : index
    %12 = vector.load %arg7[%c0_21, %c2, %c0_22] : memref<1x18x32xf32, #tpu.memory_space<vmem>>, vector<1x16x4xf32>
    %13 = vector.shape_cast %12 : vector<1x16x4xf32> to vector<16x4xf32>
    %14 = tpu.concatenate %9, %11, %13 in 1 : vector<16x4xf32>, vector<16x4xf32>, vector<16x4xf32> -> vector<16x12xf32>
    %cst_23 = arith.constant dense<0.000000e+00> : vector<16x32xf32>
    %15 = tpu.matmul %14, %4, %cst_23 {dimension_numbers = #tpu.dot_dimension_numbers<[1], [0], [0], [1], [0, 0, 1, 1], [], []>} : vector<16x12xf32>, vector<12x32xf32>, vector<16x32xf32> -> vector<16x32xf32>
    %16 = vector.broadcast %5 : vector<1x32xf32> to vector<16x32xf32>
    %17 = arith.addf %15, %16 : vector<16x32xf32>
    %cst_24 = arith.constant 0.000000e+00 : f32
    %18 = vector.broadcast %cst_24 : f32 to vector<16x32xf32>
    %19 = arith.maximumf %17, %18 : vector<16x32xf32>
    %c0_25 = arith.constant 0 : index
    %c1_26 = arith.constant 1 : index
    %c0_27 = arith.constant 0 : index
    %20 = vector.load %arg8[%c0_25, %c1_26, %c0_27] : memref<1x18x32xf32, #tpu.memory_space<vmem>>, vector<1x16x32xf32>
    %21 = vector.shape_cast %20 : vector<1x16x32xf32> to vector<16x32xf32>
    %22 = vector.shape_cast %19 : vector<16x32xf32> to vector<1x16x32xf32>
    tpu.vector_store %arg8[%c0_25, %c1_26, %c0_27], %22 {strides = array<i32>} : memref<1x18x32xf32, #tpu.memory_space<vmem>>, vector<1x16x32xf32>,
    %c0_28 = arith.constant 0 : index
    %c0_29 = arith.constant 0 : index
    %23 = vector.load %arg4[%c0_28, %c0_29] : memref<96x32xf32, #tpu.memory_space<vmem>>, vector<96x32xf32>
    %c0_30 = arith.constant 0 : index
    %c0_31 = arith.constant 0 : index
    %24 = vector.load %arg5[%c0_30, %c0_31] : memref<1x32xf32, #tpu.memory_space<vmem>>, vector<1x32xf32>
    %c0_32 = arith.constant 0 : index
    %c0_33 = arith.constant 0 : index
    %c0_34 = arith.constant 0 : index
    %25 = vector.load %arg8[%c0_32, %c0_33, %c0_34] : memref<1x18x32xf32, #tpu.memory_space<vmem>>, vector<1x16x32xf32>
    %26 = vector.shape_cast %25 : vector<1x16x32xf32> to vector<16x32xf32>
    %c0_35 = arith.constant 0 : index
    %c1_36 = arith.constant 1 : index
    %c0_37 = arith.constant 0 : index
    %27 = vector.load %arg8[%c0_35, %c1_36, %c0_37] : memref<1x18x32xf32, #tpu.memory_space<vmem>>, vector<1x16x32xf32>
    %28 = vector.shape_cast %27 : vector<1x16x32xf32> to vector<16x32xf32>
    %c0_38 = arith.constant 0 : index
    %c2_39 = arith.constant 2 : index
    %c0_40 = arith.constant 0 : index
    %29 = vector.load %arg8[%c0_38, %c2_39, %c0_40] : memref<1x18x32xf32, #tpu.memory_space<vmem>>, vector<1x16x32xf32>
    %30 = vector.shape_cast %29 : vector<1x16x32xf32> to vector<16x32xf32>
    %31 = tpu.concatenate %26, %28, %30 in 1 : vector<16x32xf32>, vector<16x32xf32>, vector<16x32xf32> -> vector<16x96xf32>
    %cst_41 = arith.constant dense<0.000000e+00> : vector<16x32xf32>
    %32 = tpu.matmul %31, %23, %cst_41 {dimension_numbers = #tpu.dot_dimension_numbers<[1], [0], [0], [1], [0, 0, 1, 1], [], []>} : vector<16x96xf32>, vector<96x32xf32>, vector<16x32xf32> -> vector<16x32xf32>
    %33 = vector.broadcast %24 : vector<1x32xf32> to vector<16x32xf32>
    %34 = arith.addf %32, %33 : vector<16x32xf32>
    %cst_42 = arith.constant 0.000000e+00 : f32
    %35 = vector.broadcast %cst_42 : f32 to vector<16x32xf32>
    %36 = arith.maximumf %34, %35 : vector<16x32xf32>
    %cst_43 = arith.constant dense<0.000000e+00> : vector<32xf32>
    %37 = vector.multi_reduction <add>, %36, %cst_43 [0] : vector<16x32xf32> to vector<32xf32>
    %38 = vector.shape_cast %37 : vector<32xf32> to vector<1x32xf32>
    %cst_44 = arith.constant 6.250000e-02 : f32
    %39 = vector.broadcast %cst_44 : f32 to vector<1x32xf32>
    %40 = arith.mulf %38, %39 : vector<1x32xf32>
    %c0_45 = arith.constant 0 : index
    %c0_46 = arith.constant 0 : index
    %c0_47 = arith.constant 0 : index
    %41 = vector.load %arg6[%c0_45, %c0_46, %c0_47] : memref<1x1x32xf32, #tpu.memory_space<vmem>>, vector<1x1x32xf32>
    %42 = vector.shape_cast %41 : vector<1x1x32xf32> to vector<1x32xf32>
    %43 = vector.shape_cast %40 : vector<1x32xf32> to vector<1x1x32xf32>
    tpu.vector_store %arg6[%c0_45, %c0_46, %c0_47], %43 {strides = array<i32>} : memref<1x1x32xf32, #tpu.memory_space<vmem>>, vector<1x1x32xf32>,
    return
  }
  func.func @transform_0(%arg0: i32) -> (i32, i32, i32) {
    %c0_i32 = arith.constant 0 : i32
    %c0_i32_0 = arith.constant 0 : i32
    %c0_i32_1 = arith.constant 0 : i32
    return %arg0, %c0_i32, %c0_i32_0 : i32, i32, i32
  }
  func.func @transform_1(%arg0: i32) -> (i32, i32) {
    %c0_i32 = arith.constant 0 : i32
    %c0_i32_0 = arith.constant 0 : i32
    %c0_i32_1 = arith.constant 0 : i32
    return %c0_i32, %c0_i32_0 : i32, i32
  }
  func.func @transform_2(%arg0: i32) -> (i32, i32) {
    %c0_i32 = arith.constant 0 : i32
    %c0_i32_0 = arith.constant 0 : i32
    %c0_i32_1 = arith.constant 0 : i32
    return %c0_i32, %c0_i32_0 : i32, i32
  }
  func.func @transform_3(%arg0: i32) -> (i32, i32) {
    %c0_i32 = arith.constant 0 : i32
    %c0_i32_0 = arith.constant 0 : i32
    %c0_i32_1 = arith.constant 0 : i32
    return %c0_i32, %c0_i32_0 : i32, i32
  }
  func.func @transform_4(%arg0: i32) -> (i32, i32) {
    %c0_i32 = arith.constant 0 : i32
    %c0_i32_0 = arith.constant 0 : i32
    %c0_i32_1 = arith.constant 0 : i32
    return %c0_i32, %c0_i32_0 : i32, i32
  }
  func.func @transform_5(%arg0: i32) -> (i32, i32, i32) {
    %c0_i32 = arith.constant 0 : i32
    %c0_i32_0 = arith.constant 0 : i32
    %c0_i32_1 = arith.constant 0 : i32
    return %arg0, %c0_i32, %c0_i32_0 : i32, i32, i32
  }
}

</mosaic_0001>

<bundles_post_ra>
// kernel: tpu_custom_call.1
= control target key start
LH: loop header
LB: loop body
LE: loop exit
PB: predicated region body
PF: predicated region fallthrough
CT: control target
= control target key end

     0   :  { %10 = vsyncpa [#allocation5], 0  ;;  %s779_s0 = inlined_call_operand.vmem [shape: f32[2,16,4], index: 0, kind: input, shape index: {}]   ;;  %s780_s1 = inlined_call_operand.vmem [shape: f32[12,32], index: 1, kind: input, shape index: {}]   ;;  %s781_s2 = inlined_call_operand.vmem [shape: f32[1,32], index: 2, kind: input, shape index: {}]   ;;  %s782_s3 = inlined_call_operand.vmem [shape: f32[96,32], index: 3, kind: input, shape index: {}]   ;;  %s783_s4 = inlined_call_operand.vmem [shape: f32[1,32], index: 4, kind: input, shape index: {}]   ;;  %s784_s5 = inlined_call_operand.hbm [shape: f32[2,1,32], index: 5, kind: output, shape index: {}]  }
   0x1   :  { %12 = vsyncpa [#allocation5 + $0x1], 0  ;;  %s632_s18 = smov 0   ;;  %s634_s19 = smov 0  }
   0x2   :  { %s636_s20 = smov 0   ;;  %s638_s21 = smov 0  }
   0x3 LB: > { %s653_s22 = sadd.s32 4294967295, %s595_s21   ;;  %s461_s23 = sadd.s32 4294967294, %s595_s21   ;;  %s595_s21 = sphi %s638_s21, %s790_s21   ;;  %s591_s20 = sphi %s636_s20, %s789_s20   ;;  %s587_s19 = sphi %s634_s19, %s788_s19   ;;  %s583_s18 = sphi %s632_s18, %s787_s18  }
   0x4   : > { %s657_s24 = sadd.s32 1, %s595_s21   ;;  %s135_s25 = sadd.s32 1, %s591_s20 }
   0x5   : > { %s132_s26 = ssub.s32 %s595_s21, %s657_s24  ;;  %p145_p0 = scmp.ne.s32.totalorder %s591_s20, %s587_s19 }
   0x6   : > { %p133_p1 = scmp.eq.s32.totalorder %s132_s26, 0  ;;  %p146_p2 = scmp.eq.s32.totalorder %s653_s22, 1 }
   0x7   : > { %p151_p3 = scmp.ne.s32.totalorder %s587_s19, %s583_s18  ;;  %p152_p4 = scmp.eq.s32.totalorder %s461_s23, 1 }
   0x8   : > { %s668_s27 = scalar_select %p133_p1, %s591_s20, %s135_s25  }
   0x9   : > { %p670_p5 = por %p146_p2, %p145_p0  ;;  %p674_p6 = por %p152_p4, %p151_p3 }
   0xa   : > { %p464_p7 = scmp.ge.s32.totalorder %s595_s21, 1  ;;  %p190_p8 = scmp.lt.s32.totalorder %s595_s21, 3 }
   0xc   : > { %p191_p9 = pnand %p464_p7, %p190_p8 }
   0xd   : > { %p217_p10 = scmp.lt.s32.totalorder (!%p191_p9), %s653_s22, 1  ;;  %s598_s10 = smov (!%p191_p9), 4  }
   0xe   : > { %194 = sbr.rel (%p191_p9) target bundleno = 571 (0x23b), region = 40  ;;  %s599_s11 = smov (!%p191_p9), 8  }
   0xf   : > { %s600_s16 = smov (!%p191_p9), 32   ;;  %s601_s17 = smov (!%p191_p9), 64  }
  0x10   : > { %s215_s14 = sand.u32 (!%p191_p9), 1, %s587_s19  }
  0x11   : > { %s216_s23 = scalar_lea.vmem (!%p191_p9), [#allocation4], %s215_s14 }
  0x12   : > { %s404_s25 = sshll.u32 (!%p191_p9), %s216_s23, 4  ;;  %s405_s25 = int_to_ptr.vmem [resolvable:$true] %s404_s25 }
  0x13   : > { %vm222_vm0 = vcmask 261120   ;;  %v597_v0 = vmov 0.0   ;;  %s218_s30 = scalar_select %p217_p10, %s653_s22, 1  ;;  %vm225_vm1 = vcmask 254976   ;;  %vm229_vm2 = vcmask 31744   ;;  %v232_v8 = vld [vmem:[%s780_s1] sm:$0xff] }
  0x14   : > { %223 = vst.msk [vmem:[#allocation2] sm:$0xff] %vm222_vm0, %v597_v0  ;;  %v233_v7 = vld [vmem:[%s780_s1 + $0x8] sm:$0xf]  ;;  %vm275_vm3 = vcmask 1043456   ;;  %vm262_vm4 = vcmask 64512   ;;  %vm268_vm5 = vcmask 97280  }
  0x15   : > { %224 = vst.msk [vmem:[#allocation2 + $0x8] sm:$0xff] %vm222_vm0, %v597_v0  ;;  %s474_s6 = sshll.u32 %s218_s30, 4  ;;  %467 = vmatpush.msk.msra.mxu0 %vm275_vm3, %v233_v7  ;;  %v531_v19 = vld [vmem:[%s781_s2] ss:$0 sm:$0xff]  ;;  %v317_v20 = vld [vmem:[%s782_s3 + $0x58] sm:$0xff]  ;;  %v316_v21 = vld [vmem:[%s782_s3 + $0x50] sm:$0xff] }
  0x16   : > { %235 = vst.msk [vmem:[#allocation3] sm:$0xff] %vm222_vm0, %v597_v0  ;;  %s221_s9 = scalar_lea.vmem %s779_s0, %s474_s6  ;;  %475 = vmatpush.msra.mxu2 %v317_v20  ;;  %360 = vmatpush.msra.mxu1 %v317_v20  ;;  %v315_v22 = vld [vmem:[%s782_s3 + $0x48] sm:$0xff]  ;;  %v314_v25 = vld [vmem:[%s782_s3 + $0x40] sm:$0xff]  ;;  %v313_v27 = vld [vmem:[%s782_s3 + $0x38] sm:$0xff]  ;;  %vm343_vm6 = vcmask 523264   ;;  %vm349_vm7 = vcmask 785408  }
  0x17   : > { %236 = vst.msk [vmem:[#allocation3 + $0x8] sm:$0xff] %vm222_vm0, %v597_v0  ;;  %v227_v1 = vld [vmem:[%s221_s9] sm:$0xff]  ;;  %v228_v2 = vld [vmem:[%s221_s9 + $0x8] sm:$0xff]  ;;  %294 = vmatpush.msra.mxu0 %v232_v8  ;;  %v312_v28 = vld [vmem:[%s782_s3 + $0x30] sm:$0xff]  ;;  %vm391_vm8 = vcmask 253952   ;;  %s394_s30 = scalar_lea.sflag [#allocation5], %s215_s14 }
  0x18   : > { %226 = vst.msk [vmem:[#allocation2 + $0x10] sm:$0x3] %vm225_vm1, %v597_v0  ;;  %476 = vmatpush.msra.mxu2 %v316_v21  ;;  %361 = vmatpush.msra.mxu1 %v316_v21  ;;  %v311_v29 = vld [vmem:[%s782_s3 + $0x28] sm:$0xff]  ;;  %v310_v37 = vld [vmem:[%s782_s3 + $0x20] sm:$0xff]  ;;  %v309_v38 = vld [vmem:[%s782_s3 + $0x18] sm:$0xff]  ;;  %s553_s9 = scalar_lea.hbm %s784_s5, 2 }
  0x19   : > { %237 = vst.msk [vmem:[#allocation3 + $0x10] sm:$0x3] %vm225_vm1, %v597_v0  ;;  %v308_v39 = vld [vmem:[%s782_s3 + $0x10] sm:$0xff]  ;;  %v307_v40 = vld [vmem:[%s782_s3 + $0x8] sm:$0xff]  ;;  %v306_v41 = vld [vmem:[%s782_s3] sm:$0xff] }
  0x1a   : > { %230 = vst.msk [vmem:[#allocation2 + $0x1] sm:$0xff] %vm229_vm2, %v227_v1  ;;  %477 = vmatpush.msra.mxu2 %v315_v22  ;;  %362 = vmatpush.msra.mxu1 %v315_v22  ;;  %v532_v52 = vld [vmem:[%s783_s4] ss:$0 sm:$0xff] }
  0x1b   : > { %231 = vst.msk [vmem:[#allocation2 + $0x9] sm:$0xff] %vm229_vm2, %v228_v2 }
  0x1c   : > { %478 = vmatpush.msra.mxu2 %v314_v25  ;;  %363 = vmatpush.msra.mxu1 %v314_v25 }
  0x1e   : > { %479 = vmatpush.msra.mxu2 %v313_v27  ;;  %364 = vmatpush.msra.mxu1 %v313_v27 }
  0x20   : > { %480 = vmatpush.msra.mxu2 %v312_v28  ;;  %365 = vmatpush.msra.mxu1 %v312_v28 }
  0x21   : > { %v240_v3 = vld [vmem:[#allocation2 + $0x1] sm:$0xff] }
  0x22   : > { %246 = vrot.lane.b32.xlu0 %v240_v3, %s598_s10  ;;  %v241_v4 = vld [vmem:[#allocation2 + $0x9] sm:$0xff]  ;;  %v238_v11 = vld [vmem:[#allocation2] sm:$0xff]  ;;  %481 = vmatpush.msra.mxu2 %v311_v29 }
  0x23   : > { %248 = vrot.lane.b32.xlu1 %v241_v4, %s598_s10  ;;  %v242_v5 = vld [vmem:[#allocation2 + $0x2] sm:$0xff]  ;;  %v243_v6 = vld [vmem:[#allocation2 + $0xa] sm:$0xff]  ;;  %366 = vmatpush.msra.mxu1 %v311_v29 }
  0x24   : > { %v239_v15 = vld [vmem:[#allocation2 + $0x8] sm:$0xff]  ;;  %482 = vmatpush.msra.mxu2 %v310_v37 }
  0x25   : > { %367 = vmatpush.msra.mxu1 %v310_v37 }
  0x26   : > { %483 = vmatpush.msra.mxu2 %v309_v38 }
  0x27   : > { %368 = vmatpush.msra.mxu1 %v309_v38 }
  0x28   : > { %484 = vmatpush.msra.mxu2 %v308_v39 }
  0x29   : > { %369 = vmatpush.msra.mxu1 %v308_v39 }
  0x2a   : > { %254 = vrot.lane.b32.xlu0 %v242_v5, %s599_s11  ;;  %485 = vmatpush.msra.mxu2 %v307_v40 }
  0x2b   : > { %256 = vrot.lane.b32.xlu1 %v243_v6, %s599_s11  ;;  %370 = vmatpush.msra.mxu1 %v307_v40 }
  0x2c   : > { %486 = vmatpush.msra.mxu2 %v306_v41 }
  0x2d   : > { %371 = vmatpush.msra.mxu1 %v306_v41 }
  0x94   : > { %v247_v9 = vpop.permute.xlu0 %246 }
  0x95   : > { %v249_v10 = vpop.permute.xlu1 %248  ;;  %v260_v12 = vsel %vm229_vm2, %v238_v11, %v247_v9 }
  0x96   : > { %v261_v16 = vsel %vm229_vm2, %v239_v15, %v249_v10 }
  0x9c   : > { %v255_v13 = vpop.permute.xlu0 %254 }
  0x9d   : > { %v263_v14 = vsel %vm262_vm4, %v260_v12, %v255_v13  ;;  %v257_v17 = vpop.permute.xlu1 %256 }
  0x9e   : > { %468 = vmatmul.msk.f32.vlgmr.msra.gmra.mxu0 %vm268_vm5, %v263_v14  ;;  %v264_v18 = vsel %vm262_vm4, %v261_v16, %v257_v17 }
  0xa6   : > { %469 = vmatmul.msk.f32.gmra.mxu0 %vm268_vm5, %v264_v18 }
 0x11b   : > { %v296_v23 = vpop.f32.mrf.mxu0 }
 0x11c   : > { %v297_v24 = vadd.f32 %v531_v19, %v296_v23 }
 0x11e   : > { %v302_v26 = vmax.f32 %v297_v24, 0.0 }
 0x120   : > { %304 = vst.msk [vmem:[#allocation3 + $0x1] sm:$0xff] %vm222_vm0, %v302_v26 }
 0x123   : > { %v299_v30 = vpop.f32.mrf.mxu0 }
 0x124   : > { %v300_v31 = vadd.f32 %v531_v19, %v299_v30 }
 0x126   : > { %v303_v32 = vmax.f32 %v300_v31, 0.0 }
 0x127   : > { %v321_v33 = vld [vmem:[#allocation3 + $0x1] sm:$0xff] }
 0x128   : > { %305 = vst.msk [vmem:[#allocation3 + $0x9] sm:$0xff] %vm222_vm0, %v303_v32  ;;  %327 = vrot.lane.b32.xlu0 %v321_v33, %s600_s16  ;;  %v319_v48 = vld [vmem:[#allocation3] sm:$0xff] }
 0x12f   : > { %v322_v34 = vld [vmem:[#allocation3 + $0x9] sm:$0xff] }
 0x130   : > { %v323_v35 = vld [vmem:[#allocation3 + $0x2] sm:$0xff]  ;;  %329 = vrot.lane.b32.xlu2 %v322_v34, %s600_s16  ;;  %v324_v36 = vld [vmem:[#allocation3 + $0xa] sm:$0xff] }
 0x131   : > { %335 = vrot.lane.b32.xlu1 %v323_v35, %s601_s17  ;;  %v320_v43 = vld [vmem:[#allocation3 + $0x8] sm:$0xff] }
 0x138   : > { %337 = vrot.lane.b32.xlu2 %v324_v36, %s601_s17  ;;  %s402_s17 = scalar_lea.hbm %s784_s5, %s653_s22 }
 0x139   : > { %s406_s26 = sshll.u32 %s402_s17, 4  ;;  %s407_s26 = int_to_ptr.hbm [resolvable:$true] %s406_s26 }
 0x13a   : > { %s547_s6 = sshra.s32 %s407_s26, 4  ;;  %s548_s6 = int_to_ptr.hbm [resolvable:$true] %s547_s6 }
 0x13b   : > { %s549_s7 = scalar_lea.hbm %s548_s6, 1  ;;  %p554_p0 = scmp.lt.s32.totalorder %s548_s6, %s784_s5 }
 0x13c   : > { %p550_p11 = scmp.ne.s32.totalorder %s548_s6, %s549_s7  ;;  %p555_p1 = scmp.lt.s32.totalorder %s553_s9, %s549_s7 }
 0x13e   : > { %p551_p12 = pnand %p550_p11, %p670_p5  ;;  %p556_p2 = por %p555_p1, %p554_p0 }
 0x140   : > { %p552_p13 = pneg %p551_p12 }
 0x142   : > { %p557_p3 = pnand %p556_p2, %p552_p13 }
 0x18a   : > { %v330_v42 = vpop.permute.xlu2 %329 }
 0x18b   : > { %v342_v44 = vsel %vm222_vm0, %v320_v43, %v330_v42 }
 0x192   : > { %v338_v45 = vpop.permute.xlu2 %337 }
 0x193   : > { %v345_v46 = vsel %vm343_vm6, %v342_v44, %v338_v45 }
 0x194   : > { %471 = vmatmul.msk.f32.vlgmr.msra.gmra.mxu2 %vm349_vm7, %v345_v46 }
 0x19a   : > { %v328_v47 = vpop.permute.xlu0 %327 }
 0x19b   : > { %v341_v49 = vsel %vm222_vm0, %v319_v48, %v328_v47 }
 0x1a3   : > { %v336_v50 = vpop.permute.xlu1 %335 }
 0x1a4   : > { %v344_v51 = vsel %vm343_vm6, %v341_v49, %v336_v50 }
 0x1a5   : > { %470 = vmatmul.msk.f32.vlgmr.msra.gmra.mxu1 %vm349_vm7, %v344_v51 }
 0x217   : > { %v376_v53 = vpop.f32.mrf.mxu2 }
 0x218   : > { %v377_v54 = vadd.f32 %v532_v52, %v376_v53 }
 0x21a   : > { %v380_v56 = vmax.f32 %v377_v54, 0.0 }
 0x21c   : > { %v382_v59 = vsel %vm222_vm0, %v380_v56, 0.0 }
 0x222   : > { %v373_v55 = vpop.f32.mrf.mxu1 }
 0x223   : > { %v374_v57 = vadd.f32 %v532_v52, %v373_v55 }
 0x225   : > { %v379_v58 = vmax.f32 %v374_v57, 0.0 }
 0x227   : > { %v381_v60 = vsel %vm222_vm0, %v379_v58, 0.0 }
 0x228   : > { %v383_v61 = vadd.f32 %v382_v59, %v381_v60 }
 0x22a   : > { %v384_v62 = vrot.slane %v383_v61, 4 }
 0x22c   : > { %v385_v63 = vadd.f32 %v384_v62, %v383_v61 }
 0x22e   : > { %v386_v0 = vrot.slane %v385_v63, 2 }
 0x230   : > { %v387_v1 = vadd.f32 %v386_v0, %v385_v63 }
 0x232   : > { %v388_v2 = vrot.slane %v387_v1, 1 }
 0x234   : > { %v389_v3 = vadd.f32 %v388_v2, %v387_v1 }
 0x236   : > { %v390_v4 = vmul.f32 0.0625, %v389_v3 }
 0x238   : > { %392 = vst.msk [vmem:[%s216_s23] sm:$0x1] %vm391_vm8, %v390_v4 }
 0x239   : > { %560 = shalt.err (!%p557_p3)
}
 0x23a   : > { %487 = dma.vmem_to_hbm [thread:$0]  (%p670_p5), %s405_s25, 16, %s407_s26, %s394_s30  }
 0x23b PF: > { %p493_p4 = scmp.ge.s32.totalorder %s595_s21, 2  ;;  %s418_s12 = sand.u32 1, %s583_s18  }
 0x23c   : > { %s419_s13 = scalar_lea.sflag [#allocation5], %s418_s12 }
 0x23d   : > { %p490_p7 = pnand %p493_p4, %p674_p6 }
 0x23f   : > { %p491_p8 = pneg %p490_p7 }
 0x241   : > { %578 = dma.done.wait (%p491_p8), %s419_s13, 16  }
 0x242   : > { %580 = vsyncadd (%p491_p8), %s419_s13, 4294967280  ;;  %p15_p9 = scmp.ge.s32.totalorder %s657_s24, 4   ;;  %s787_s18 = smov %s587_s19 }
 0x243   : > { %s788_s19 = smov %s591_s20  ;;  %s789_s20 = smov %s668_s27 }
 0x244   : > { %s790_s21 = smov %s657_s24  ;;  %17 = sbr.rel (!%p15_p9) target bundleno = 3 (0x3), region = 75 }
 0x249   :  { %424 = vsyncpa [#allocation5], 1 }
 0x24a   :  { %426 = vsyncpa [#allocation5 + $0x1], 1 }

</bundles_post_ra>
